<compile_context>
chip_gen: v6e
topology: v6e:2x2x1
jax: 0.10.0
libtpu: 0.0.40
codegen_flags: <defaults>
</compile_context>

<pallas_src>
import jax
import jax.numpy as jnp
from jax.experimental import pallas as pl
from jax.experimental.pallas import tpu as pltpu


def _round_up(x: int, m: int) -> int:
    return ((x + m - 1) // m) * m


def sgns_loss_kernel(c_ref, t_ref, o_ref):
    """One chunk of TB batch elements.

    c_ref: (TB, C_pad, D)  bf16  context vectors (zero-padded rows).
    t_ref: (TB, NPAD, D)   bf16  [target ; -negatives ; zero-pad rows].
    o_ref: (1, 8, NPAD)    f32   lane-dense partial-sum tile for this chunk.
    """
    cvec = c_ref[...]
    allt = t_ref[...]

    # scores[b, c, n] = <cvec[b, c, :], allt[b, n, :]>  (batched MXU matmul).
    scores = jnp.einsum(
        "bcd,bnd->bcn", cvec, allt, preferred_element_type=jnp.float32
    )  # (TB, C_pad, NPAD) float32

    # torch: -log(sigmoid(x))  ==  softplus(-x), numerically stable form.
    nll = jnp.maximum(-scores, 0.0) + jnp.log(1.0 + jnp.exp(-jnp.abs(scores)))

    # Fold down to a single lane-dense (8, NPAD) tile with plain vreg adds
    # (no per-step cross-lane / scalar reduction).  C_pad % 8 == 0 so the
    # reshape is tile-aligned (identity when C_pad == 8).
    tb, c_pad, npad = nll.shape
    partial = nll.reshape(tb * c_pad // 8, 8, npad).sum(axis=0)
    o_ref[0] = partial


def sgns_forward(tvectors, cvectors, titems, citems, nitems, *, sub_batch=None):
    """Pallas implementation of SGNS.forward (weights=None path).

    tvectors, cvectors: (V, D) embedding tables.
    titems: (B,) int32, citems: (B, C) int32, nitems: (B, n_negs) int32.
    Returns the scalar loss (float32), matching
        -loss.sigmoid().log().sum(2).sum(1).mean()
    """
    B, C = citems.shape
    n_negs = nitems.shape[1]
    D = tvectors.shape[1]
    n1 = 1 + n_negs

    # ---- JAX-side glue: gathers / negation / concat (XLA fuses these). ----
    compute_dtype = jnp.bfloat16
    tv16 = tvectors.astype(compute_dtype)
    cv16 = cvectors.astype(compute_dtype)
    tvec = tv16[titems]                       # (B, D)         forward_t(titems)
    cvec = cv16[citems]                       # (B, C, D)      forward_c(citems)
    nvec = -tv16[nitems]                      # (B, n_negs, D) forward_t(nitems).neg()
    all_t = jnp.concatenate([tvec[:, None, :], nvec], axis=1)  # (B, n1, D)

    # ---- Padding for lane-dense tiles and a batched grid. ----
    NPAD = _round_up(n1, 128)                 # lane width of score/acc tiles
    C_pad = _round_up(C, 8)                   # sublane-aligned context rows
    if sub_batch is None:
        TB = 64 if B >= 64 else 8             # sub-batch per grid step
    else:
        TB = _round_up(sub_batch, 8)
    B_pad = _round_up(B, TB)
    n_chunks = B_pad // TB

    cvec = jnp.pad(cvec, ((0, B_pad - B), (0, C_pad - C), (0, 0)))
    all_t = jnp.pad(all_t, ((0, B_pad - B), (0, NPAD - n1), (0, 0)))

    partials = pl.pallas_call(
        sgns_loss_kernel,
        out_shape=jax.ShapeDtypeStruct((n_chunks, 8, NPAD), jnp.float32),
        grid_spec=pltpu.PrefetchScalarGridSpec(
            num_scalar_prefetch=0,
            grid=(n_chunks,),
            in_specs=[
                pl.BlockSpec((TB, C_pad, D), lambda i: (i, 0, 0)),
                pl.BlockSpec((TB, NPAD, D), lambda i: (i, 0, 0)),
            ],
            out_specs=pl.BlockSpec((1, 8, NPAD), lambda i: (i, 0, 0)),
        ),
        compiler_params=pltpu.CompilerParams(
            dimension_semantics=("parallel",),
        ),
    )(cvec, all_t)

    # Final scalar reduce + zero-pad correction, once, outside the loop.
    # Every padded (batch / context / negative-column) entry scored exactly 0
    # and contributed softplus(0) = log(2) inside the kernel.
    total = jnp.sum(partials, dtype=jnp.float32)
    n_zero_entries = B_pad * C_pad * NPAD - B * C * n1
    total = total - jnp.float32(n_zero_entries) * jnp.log(jnp.float32(2.0))
    return total / jnp.float32(B)


if __name__ == "__main__":
    # Small deterministic setup consistent with the module.
    vocab_size = 100
    D = 32            # embedding dim
    B = 2             # batch
    C = 8             # context size
    n_negs = 20

    key = jax.random.PRNGKey(0)
    k1, k2, k3, k4, k5 = jax.random.split(key, 5)

    # Deterministic "embedding" parameters (tvectors / cvectors tables).
    tvectors = jax.random.normal(k1, (vocab_size, D), dtype=jnp.float32) * 0.1
    cvectors = jax.random.normal(k2, (vocab_size, D), dtype=jnp.float32) * 0.1

    titems = jax.random.randint(k3, (B,), 0, vocab_size, dtype=jnp.int32)
    citems = jax.random.randint(k4, (B, C), 0, vocab_size, dtype=jnp.int32)
    # weights=None path: negatives drawn uniformly in [0, vocab_size - 1].
    # TODO(synk): weighted multinomial negative sampling (weights**0.75) is
    # host-side sampling glue and is not implemented in-kernel.
    nitems = jax.random.randint(k5, (B, n_negs), 0, vocab_size, dtype=jnp.int32)

    loss = jax.jit(sgns_forward)(tvectors, cvectors, titems, citems, nitems)
    loss = jax.block_until_ready(loss)

    # Pure-JAX reference for the torch semantics, using the same bf16-quantised
    # operands the kernel consumes (math in f32).
    tv16 = tvectors.astype(jnp.bfloat16).astype(jnp.float32)
    cv16 = cvectors.astype(jnp.bfloat16).astype(jnp.float32)
    tvec = tv16[titems]
    cvec = cv16[citems]
    nvec = -tv16[nitems]
    all_t = jnp.concatenate([tvec[:, None, :], nvec], axis=1)
    scores = jnp.einsum("bcd,bnd->bcn", cvec, all_t)
    ref = -jnp.mean(jnp.sum(jnp.log(jax.nn.sigmoid(scores)), axis=(1, 2)))

    assert jnp.allclose(loss, ref, rtol=1e-3, atol=1e-2), (loss, ref)
    print("KERNEL_OK")
</pallas_src>

<mosaic_0001>
module attributes {stable_mosaic.version = 11 : i64} {
  func.func @sgns_loss_kernel(%arg0: i32, %arg1: memref<8x8x32xbf16, #tpu.memory_space<vmem>>, %arg2: memref<8x128x32xbf16, #tpu.memory_space<vmem>>, %arg3: memref<1x8x128xf32, #tpu.memory_space<vmem>>) attributes {dimension_semantics = [#tpu.dimension_semantics<parallel>], iteration_bounds = array<i64: 1>, scalar_prefetch = 0 : i64, scratch_operands = 0 : i64, tpu.core_type = #tpu.core_type<tc>, window_params = [{transform_indices = @transform_0, window_bounds = array<i64: 8, 8, 32>}, {transform_indices = @transform_1, window_bounds = array<i64: 8, 128, 32>}, {transform_indices = @transform_2, window_bounds = array<i64: 1, 8, 128>}]} {
    %c0 = arith.constant 0 : index
    %c0_0 = arith.constant 0 : index
    %c0_1 = arith.constant 0 : index
    %0 = vector.load %arg1[%c0, %c0_0, %c0_1] : memref<8x8x32xbf16, #tpu.memory_space<vmem>>, vector<8x8x32xbf16>
    %c0_2 = arith.constant 0 : index
    %c0_3 = arith.constant 0 : index
    %c0_4 = arith.constant 0 : index
    %1 = vector.load %arg2[%c0_2, %c0_3, %c0_4] : memref<8x128x32xbf16, #tpu.memory_space<vmem>>, vector<8x128x32xbf16>
    "tpu.trace_start"() <{level = 10 : i32, message = "bcd,bnd->bcn"}> : () -> ()
    %cst = arith.constant dense<0.000000e+00> : vector<8x8x128xf32>
    %2 = tpu.matmul %0, %1, %cst {dimension_numbers = #tpu.dot_dimension_numbers<[2], [2], [1], [1], [0, 0, 0, 1, 1, 1], [0], [0]>} : vector<8x8x32xbf16>, vector<8x128x32xbf16>, vector<8x8x128xf32> -> vector<8x8x128xf32>
    "tpu.trace_stop"() : () -> ()
    %cst_5 = arith.constant 0.000000e+00 : f32
    %3 = vector.broadcast %cst_5 : f32 to vector<8x8x128xf32>
    %4 = arith.subf %3, %2 : vector<8x8x128xf32>
    %cst_6 = arith.constant 0.000000e+00 : f32
    %5 = vector.broadcast %cst_6 : f32 to vector<8x8x128xf32>
    %6 = arith.maximumf %4, %5 : vector<8x8x128xf32>
    %7 = math.absf %2 : vector<8x8x128xf32>
    %cst_7 = arith.constant 0.000000e+00 : f32
    %8 = vector.broadcast %cst_7 : f32 to vector<8x8x128xf32>
    %9 = arith.subf %8, %7 : vector<8x8x128xf32>
    %10 = math.exp %9 : vector<8x8x128xf32>
    %cst_8 = arith.constant 1.000000e+00 : f32
    %11 = vector.broadcast %cst_8 : f32 to vector<8x8x128xf32>
    %12 = arith.addf %11, %10 : vector<8x8x128xf32>
    %13 = math.log %12 : vector<8x8x128xf32>
    %14 = arith.addf %6, %13 : vector<8x8x128xf32>
    %cst_9 = arith.constant dense<0.000000e+00> : vector<8x128xf32>
    %15 = vector.multi_reduction <add>, %14, %cst_9 [0] : vector<8x8x128xf32> to vector<8x128xf32>
    %c0_10 = arith.constant 0 : index
    %c0_11 = arith.constant 0 : index
    %c0_12 = arith.constant 0 : index
    %16 = vector.load %arg3[%c0_10, %c0_11, %c0_12] : memref<1x8x128xf32, #tpu.memory_space<vmem>>, vector<1x8x128xf32>
    %17 = vector.shape_cast %16 : vector<1x8x128xf32> to vector<8x128xf32>
    %18 = vector.shape_cast %15 : vector<8x128xf32> to vector<1x8x128xf32>
    tpu.vector_store %arg3[%c0_10, %c0_11, %c0_12], %18 {strides = array<i32>} : memref<1x8x128xf32, #tpu.memory_space<vmem>>, vector<1x8x128xf32>,
    return
  }
  func.func @transform_0(%arg0: i32) -> (i32, i32, i32) {
    %c0_i32 = arith.constant 0 : i32
    %c0_i32_0 = arith.constant 0 : i32
    %c0_i32_1 = arith.constant 0 : i32
    return %arg0, %c0_i32, %c0_i32_0 : i32, i32, i32
  }
  func.func @transform_1(%arg0: i32) -> (i32, i32, i32) {
    %c0_i32 = arith.constant 0 : i32
    %c0_i32_0 = arith.constant 0 : i32
    %c0_i32_1 = arith.constant 0 : i32
    return %arg0, %c0_i32, %c0_i32_0 : i32, i32, i32
  }
  func.func @transform_2(%arg0: i32) -> (i32, i32, i32) {
    %c0_i32 = arith.constant 0 : i32
    %c0_i32_0 = arith.constant 0 : i32
    %c0_i32_1 = arith.constant 0 : i32
    return %arg0, %c0_i32, %c0_i32_0 : i32, i32, i32
  }
}

</mosaic_0001>

<bundles_post_ra>
// kernel: neg.0
= control target key start
LH: loop header
LB: loop body
LE: loop exit
PB: predicated region body
PF: predicated region fallthrough
CT: control target
= control target key end

     0   :  { %v64_v13 = vmov 0.0   ;;  %s99_s0 = inlined_call_operand.vmem [shape: bf16[40,32], index: 0, kind: input, shape index: {}]   ;;  %s100_s1 = inlined_call_operand.vmem [shape: bf16[40,32], index: 1, kind: output, shape index: {}]  }
   0x1   :  { %v2_v0 = vld [vmem:[%s99_s0] sm:$0xff]   ;;  %v57_v1 = vld [vmem:[%s99_s0 + $0x8] sm:$0xff]   ;;  %v61_v2 = vld [vmem:[%s99_s0 + $0x10] sm:$0xf] }
   0x2   :  { %v3_v3 = vunpack.c.l.bf16 %v2_v0  ;;  %v13_v4 = vunpack.c.h.bf16 %v2_v0  ;;  %v24_v5 = vunpack.c.l.bf16 %v57_v1  ;;  %v35_v6 = vunpack.c.h.bf16 %v57_v1 }
   0x3   :  { %v46_v7 = vunpack.c.l.bf16 %v61_v2 }
   0x4   :  { %v7_v8 = vxor.u32 2147483648, %v3_v3  ;;  %v17_v9 = vxor.u32 2147483648, %v13_v4  ;;  %v28_v10 = vxor.u32 2147483648, %v24_v5  ;;  %v39_v11 = vxor.u32 2147483648, %v35_v6 }
   0x5   :  { %v50_v12 = vxor.u32 2147483648, %v46_v7 }
   0x6   :  { %v9_v14 = vpack.c.bf16 %v64_v13, %v7_v8  ;;  %v20_v15 = vpack.c.bf16 %v64_v13, %v17_v9  ;;  %v31_v16 = vpack.c.bf16 %v64_v13, %v28_v10  ;;  %v42_v17 = vpack.c.bf16 %v64_v13, %v39_v11 }
   0x7   :  { %v53_v18 = vpack.c.bf16 %v64_v13, %v50_v12 }
   0x8   :  { %10 = vst [vmem:[%s100_s1] sm:$0xf] %v9_v14  ;;  %56 = vst [vmem:[%s100_s1 + $0x4] sm:$0xf] %v20_v15 }
   0x9   :  { %58 = vst [vmem:[%s100_s1 + $0x8] sm:$0xf] %v31_v16  ;;  %60 = vst [vmem:[%s100_s1 + $0xc] sm:$0xf] %v42_v17 }
   0xa   :  { %62 = vst [vmem:[%s100_s1 + $0x10] sm:$0xf] %v53_v18 }

// kernel: sgns_forward.1
= control target key start
LH: loop header
LB: loop body
LE: loop exit
PB: predicated region body
PF: predicated region fallthrough
CT: control target
= control target key end

     0   :  { %vm188_vm0 = vcmask 261120   ;;  %v1499_v0 = vmov 0.0   ;;  %vm1500_vm1 = vmmov 0   ;;  %s1887_s1 = inlined_call_operand.vmem [shape: bf16[8,128,32], index: 1, kind: input, shape index: {}]   ;;  %s1888_s0 = inlined_call_operand.vmem [shape: bf16[8,8,32], index: 0, kind: input, shape index: {}]   ;;  %s1889_s2 = inlined_call_operand.vmem [shape: f32[1,8,128], index: 2, kind: output, shape index: {}]  }
   0x1   :  { %1241 = vmatprep.subr.bf16.mxu0 %v1499_v0  ;;  %1261 = vmatprep.subr.bf16.mxu1 %v1499_v0  ;;  %v1403_v1 = vld [vmem:[%s1887_s1 + $0x38] sm:$0xff]   ;;  %v1405_v5 = vld [vmem:[%s1887_s1 + $0x30] sm:$0xff]   ;;  %v1407_v9 = vld [vmem:[%s1887_s1 + $0x28] sm:$0xff]  }
   0x2   :  { %v1404_v2 = vld [vmem:[%s1887_s1 + $0x78] sm:$0xff]   ;;  %1257 = vmatprep.mubr.msk.bf16.mxu0 %vm1500_vm1, %v1499_v0  ;;  %1277 = vmatprep.mubr.msk.bf16.mxu1 %vm1500_vm1, %v1499_v0  ;;  %v214_v3 = vsel %vm188_vm0, %v1403_v1, 0  ;;  %v1406_v6 = vld [vmem:[%s1887_s1 + $0x70] sm:$0xff]   ;;  %v211_v7 = vsel %vm188_vm0, %v1405_v5, 0  ;;  %v1408_v10 = vld [vmem:[%s1887_s1 + $0x68] sm:$0xff]   ;;  %v208_v11 = vsel %vm188_vm0, %v1407_v9, 0 }
   0x3   :  { %1242 = vmatpush3.bf16.xpose.msra.mxu0 %v214_v3  ;;  %v321_v4 = vsel %vm188_vm0, %v1404_v2, 0  ;;  %v318_v8 = vsel %vm188_vm0, %v1406_v6, 0  ;;  %v315_v12 = vsel %vm188_vm0, %v1408_v10, 0  ;;  %v1409_v13 = vld [vmem:[%s1887_s1 + $0x20] sm:$0xff]   ;;  %v1411_v17 = vld [vmem:[%s1887_s1 + $0x18] sm:$0xff]   ;;  %v1413_v21 = vld [vmem:[%s1887_s1 + $0x10] sm:$0xff]  }
   0x4   :  { %1262 = vmatpush3.bf16.xpose.msra.mxu1 %v321_v4  ;;  %1243 = vmatprep.subr.bf16.mxu0 %v1499_v0  ;;  %v1410_v14 = vld [vmem:[%s1887_s1 + $0x60] sm:$0xff]   ;;  %v205_v15 = vsel %vm188_vm0, %v1409_v13, 0  ;;  %v1412_v18 = vld [vmem:[%s1887_s1 + $0x58] sm:$0xff]   ;;  %v202_v19 = vsel %vm188_vm0, %v1411_v17, 0  ;;  %v1414_v22 = vld [vmem:[%s1887_s1 + $0x50] sm:$0xff]   ;;  %v199_v23 = vsel %vm188_vm0, %v1413_v21, 0 }
   0x5   :  { %1263 = vmatprep.subr.bf16.mxu1 %v1499_v0  ;;  %v312_v16 = vsel %vm188_vm0, %v1410_v14, 0  ;;  %v309_v20 = vsel %vm188_vm0, %v1412_v18, 0  ;;  %v306_v24 = vsel %vm188_vm0, %v1414_v22, 0  ;;  %v1415_v25 = vld [vmem:[%s1887_s1 + $0x8] sm:$0xff]   ;;  %v1417_v29 = vld [vmem:[%s1887_s1] sm:$0xff]   ;;  %v1419_v33 = vld [vmem:[%s1887_s1 + $0xb8] sm:$0xff]  }
   0x6   :  { %v1416_v26 = vld [vmem:[%s1887_s1 + $0x48] sm:$0xff]   ;;  %v196_v27 = vsel %vm188_vm0, %v1415_v25, 0  ;;  %v1418_v30 = vld [vmem:[%s1887_s1 + $0x40] sm:$0xff]   ;;  %v193_v31 = vsel %vm188_vm0, %v1417_v29, 0  ;;  %v1420_v34 = vld [vmem:[%s1887_s1 + $0xf8] sm:$0xff]   ;;  %v428_v37 = vsel %vm188_vm0, %v1419_v33, 0 }
   0x7   :  { %v303_v28 = vsel %vm188_vm0, %v1416_v26, 0  ;;  %v300_v32 = vsel %vm188_vm0, %v1418_v30, 0  ;;  %v12_v35 = vld [vmem:[%s1888_s0] sm:$0xf]  ;;  %v13_v36 = vld [vmem:[%s1888_s0 + $0x4] sm:$0xf] }
   0x8   :  { %v535_v38 = vsel %vm188_vm0, %v1420_v34, 0  ;;  %v1421_v39 = vld [vmem:[%s1887_s1 + $0xb0] sm:$0xff]   ;;  %v1423_v43 = vld [vmem:[%s1887_s1 + $0xa8] sm:$0xff]   ;;  %v1425_v47 = vld [vmem:[%s1887_s1 + $0xa0] sm:$0xff]  }
   0x9   :  { %v1422_v40 = vld [vmem:[%s1887_s1 + $0xf0] sm:$0xff]   ;;  %v425_v41 = vsel %vm188_vm0, %v1421_v39, 0  ;;  %v1424_v44 = vld [vmem:[%s1887_s1 + $0xe8] sm:$0xff]   ;;  %v422_v45 = vsel %vm188_vm0, %v1423_v43, 0  ;;  %v1426_v48 = vld [vmem:[%s1887_s1 + $0xe0] sm:$0xff]   ;;  %v419_v49 = vsel %vm188_vm0, %v1425_v47, 0 }
   0xa   :  { %v532_v42 = vsel %vm188_vm0, %v1422_v40, 0  ;;  %v529_v46 = vsel %vm188_vm0, %v1424_v44, 0  ;;  %v526_v50 = vsel %vm188_vm0, %v1426_v48, 0  ;;  %v1427_v51 = vld [vmem:[%s1887_s1 + $0x98] sm:$0xff]   ;;  %v1429_v55 = vld [vmem:[%s1887_s1 + $0x90] sm:$0xff]   ;;  %v1431_v59 = vld [vmem:[%s1887_s1 + $0x88] sm:$0xff]  }
   0xb   :  { %1244 = vmatpush3.bf16.xpose.msra.mxu0 %v211_v7  ;;  %v1428_v52 = vld [vmem:[%s1887_s1 + $0xd8] sm:$0xff]   ;;  %v416_v53 = vsel %vm188_vm0, %v1427_v51, 0  ;;  %v1430_v56 = vld [vmem:[%s1887_s1 + $0xd0] sm:$0xff]   ;;  %v413_v57 = vsel %vm188_vm0, %v1429_v55, 0  ;;  %v1432_v60 = vld [vmem:[%s1887_s1 + $0xc8] sm:$0xff]   ;;  %v410_v61 = vsel %vm188_vm0, %v1431_v59, 0 }
   0xc   :  { %1264 = vmatpush3.bf16.xpose.msra.mxu1 %v318_v8  ;;  %1245 = vmatprep.subr.bf16.mxu0 %v1499_v0  ;;  %v523_v54 = vsel %vm188_vm0, %v1428_v52, 0  ;;  %v520_v58 = vsel %vm188_vm0, %v1430_v56, 0  ;;  %v517_v62 = vsel %vm188_vm0, %v1432_v60, 0  ;;  %v1433_v63 = vld [vmem:[%s1887_s1 + $0x80] sm:$0xff]   ;;  %v1435_v4 = vld [vmem:[%s1887_s1 + $0x138] sm:$0xff]   ;;  %v1437_v10 = vld [vmem:[%s1887_s1 + $0x130] sm:$0xff]  }
   0xd   :  { %1265 = vmatprep.subr.bf16.mxu1 %v1499_v0  ;;  %v1434_v1 = vld [vmem:[%s1887_s1 + $0xc0] sm:$0xff]   ;;  %v407_v2 = vsel %vm188_vm0, %v1433_v63, 0  ;;  %v1436_v5 = vld [vmem:[%s1887_s1 + $0x178] sm:$0xff]   ;;  %v14_v6 = vld [vmem:[%s1888_s0 + $0x8] sm:$0xf]  ;;  %v642_v8 = vsel %vm188_vm0, %v1435_v4, 0 }
   0xe   :  { %v514_v3 = vsel %vm188_vm0, %v1434_v1, 0  ;;  %v15_v7 = vld [vmem:[%s1888_s0 + $0xc] sm:$0xf]  ;;  %v749_v9 = vsel %vm188_vm0, %v1436_v5, 0  ;;  %v1441_v18 = vld [vmem:[%s1887_s1 + $0x120] sm:$0xff]   ;;  %v1443_v22 = vld [vmem:[%s1887_s1 + $0x118] sm:$0xff]  }
   0xf   :  { %v1439_v14 = vld [vmem:[%s1887_s1 + $0x128] sm:$0xff]   ;;  %v1445_v26 = vld [vmem:[%s1887_s1 + $0x110] sm:$0xff]   ;;  %v1449_v34 = vld [vmem:[%s1887_s1 + $0x100] sm:$0xff]  }
  0x10   :  { %v1447_v30 = vld [vmem:[%s1887_s1 + $0x108] sm:$0xff]   ;;  %v1452_v39 = vld [vmem:[%s1887_s1 + $0x1f8] sm:$0xff]   ;;  %v16_v40 = vld [vmem:[%s1888_s0 + $0x10] sm:$0xf] }
  0x11   :  { %v963_v43 = vsel %vm188_vm0, %v1452_v39, 0  ;;  %v1453_v44 = vld [vmem:[%s1887_s1 + $0x1b0] sm:$0xff]   ;;  %v1455_v48 = vld [vmem:[%s1887_s1 + $0x1a8] sm:$0xff]   ;;  %v1457_v52 = vld [vmem:[%s1887_s1 + $0x1a0] sm:$0xff]  }
  0x12   :  { %v1459_v56 = vld [vmem:[%s1887_s1 + $0x198] sm:$0xff]   ;;  %v1461_v60 = vld [vmem:[%s1887_s1 + $0x190] sm:$0xff]   ;;  %v1463_v1 = vld [vmem:[%s1887_s1 + $0x188] sm:$0xff]  }
  0x13   :  { %1246 = vmatpush3.bf16.xpose.msra.mxu0 %v208_v11  ;;  %v1438_v11 = vld [vmem:[%s1887_s1 + $0x170] sm:$0xff]   ;;  %v1465_v5 = vld [vmem:[%s1887_s1 + $0x180] sm:$0xff]  }
  0x14   :  { %1266 = vmatpush3.bf16.xpose.msra.mxu1 %v315_v12  ;;  %1247 = vmatprep.subr.bf16.mxu0 %v1499_v0  ;;  %v639_v12 = vsel %vm188_vm0, %v1437_v10, 0  ;;  %v746_v13 = vsel %vm188_vm0, %v1438_v11, 0  ;;  %v19_v10 = vld [vmem:[%s1888_s0 + $0x1c] sm:$0xf] }
  0x15   :  { %1267 = vmatprep.subr.bf16.mxu1 %v1499_v0 }
  0x1b   :  { %1248 = vmatpush3.bf16.xpose.msra.mxu0 %v205_v15  ;;  %v1440_v15 = vld [vmem:[%s1887_s1 + $0x168] sm:$0xff]  }
  0x1c   :  { %1268 = vmatpush3.bf16.xpose.msra.mxu1 %v312_v16  ;;  %1249 = vmatprep.subr.bf16.mxu0 %v1499_v0  ;;  %v636_v16 = vsel %vm188_vm0, %v1439_v14, 0  ;;  %v743_v17 = vsel %vm188_vm0, %v1440_v15, 0 }
  0x1d   :  { %1269 = vmatprep.subr.bf16.mxu1 %v1499_v0 }
  0x23   :  { %1250 = vmatpush3.bf16.xpose.msra.mxu0 %v202_v19  ;;  %v1442_v19 = vld [vmem:[%s1887_s1 + $0x160] sm:$0xff]  }
  0x24   :  { %1270 = vmatpush3.bf16.xpose.msra.mxu1 %v309_v20  ;;  %1251 = vmatprep.subr.bf16.mxu0 %v1499_v0  ;;  %v633_v20 = vsel %vm188_vm0, %v1441_v18, 0  ;;  %v740_v21 = vsel %vm188_vm0, %v1442_v19, 0 }
  0x25   :  { %1271 = vmatprep.subr.bf16.mxu1 %v1499_v0 }
  0x2b   :  { %1252 = vmatpush3.bf16.xpose.msra.mxu0 %v199_v23  ;;  %v1444_v23 = vld [vmem:[%s1887_s1 + $0x158] sm:$0xff]  }
  0x2c   :  { %1272 = vmatpush3.bf16.xpose.msra.mxu1 %v306_v24  ;;  %1253 = vmatprep.subr.bf16.mxu0 %v1499_v0  ;;  %v630_v24 = vsel %vm188_vm0, %v1443_v22, 0  ;;  %v737_v25 = vsel %vm188_vm0, %v1444_v23, 0 }
  0x2d   :  { %1273 = vmatprep.subr.bf16.mxu1 %v1499_v0 }
  0x33   :  { %1254 = vmatpush3.bf16.xpose.msra.mxu0 %v196_v27  ;;  %v1446_v27 = vld [vmem:[%s1887_s1 + $0x150] sm:$0xff]  }
  0x34   :  { %1274 = vmatpush3.bf16.xpose.msra.mxu1 %v303_v28  ;;  %1255 = vmatprep.subr.bf16.mxu0 %v1499_v0  ;;  %v627_v28 = vsel %vm188_vm0, %v1445_v26, 0  ;;  %v734_v29 = vsel %vm188_vm0, %v1446_v27, 0 }
  0x35   :  { %1275 = vmatprep.subr.bf16.mxu1 %v1499_v0 }
  0x3b   :  { %1256 = vmatpush3.bf16.xpose.msra.mxu0 %v193_v31  ;;  %v1448_v31 = vld [vmem:[%s1887_s1 + $0x148] sm:$0xff]  }
  0x3c   :  { %1276 = vmatpush3.bf16.xpose.msra.mxu1 %v300_v32  ;;  %1281 = vmatprep.subr.bf16.mxu0 %v1499_v0  ;;  %v624_v32 = vsel %vm188_vm0, %v1447_v30, 0  ;;  %v731_v33 = vsel %vm188_vm0, %v1448_v31, 0 }
  0x3d   :  { %1301 = vmatprep.subr.bf16.mxu1 %v1499_v0 }
  0x42   :  { %1258 = vmatmul.mubr.msk.bf16.vlgmr.msra.gmra.mxu0 %vm188_vm0, %v12_v35  ;;  %v1450_v35 = vld [vmem:[%s1887_s1 + $0x140] sm:$0xff]  }
  0x43   :  { %1278 = vmatmul.mubr.msk.bf16.vlgmr.msra.gmra.mxu1 %vm188_vm0, %v13_v36  ;;  %1282 = vmatpush3.bf16.xpose.msra.mxu0 %v428_v37  ;;  %v621_v36 = vsel %vm188_vm0, %v1449_v34, 0  ;;  %v728_v37 = vsel %vm188_vm0, %v1450_v35, 0 }
  0x44   :  { %1302 = vmatpush3.bf16.xpose.msra.mxu1 %v535_v38  ;;  %1283 = vmatprep.subr.bf16.mxu0 %v1499_v0  ;;  %v1451_v38 = vld [vmem:[%s1887_s1 + $0x1b8] sm:$0xff]  }
  0x45   :  { %1303 = vmatprep.subr.bf16.mxu1 %v1499_v0  ;;  %1297 = vmatprep.mubr.msk.bf16.mxu0 %vm1500_vm1, %v1499_v0 }
  0x46   :  { %1317 = vmatprep.mubr.msk.bf16.mxu1 %vm1500_vm1, %v1499_v0 }
  0x4b   :  { %1284 = vmatpush3.bf16.xpose.msra.mxu0 %v425_v41  ;;  %v17_v41 = vld [vmem:[%s1888_s0 + $0x14] sm:$0xf] }
  0x4c   :  { %1304 = vmatpush3.bf16.xpose.msra.mxu1 %v532_v42  ;;  %1285 = vmatprep.subr.bf16.mxu0 %v1499_v0  ;;  %v856_v42 = vsel %vm188_vm0, %v1451_v38, 0 }
  0x4d   :  { %1305 = vmatprep.subr.bf16.mxu1 %v1499_v0 }
  0x53   :  { %1286 = vmatpush3.bf16.xpose.msra.mxu0 %v422_v45  ;;  %v1454_v45 = vld [vmem:[%s1887_s1 + $0x1f0] sm:$0xff]  }
  0x54   :  { %1306 = vmatpush3.bf16.xpose.msra.mxu1 %v529_v46  ;;  %1287 = vmatprep.subr.bf16.mxu0 %v1499_v0  ;;  %v853_v46 = vsel %vm188_vm0, %v1453_v44, 0  ;;  %v960_v47 = vsel %vm188_vm0, %v1454_v45, 0 }
  0x55   :  { %1307 = vmatprep.subr.bf16.mxu1 %v1499_v0 }
  0x5b   :  { %1288 = vmatpush3.bf16.xpose.msra.mxu0 %v419_v49  ;;  %v1456_v49 = vld [vmem:[%s1887_s1 + $0x1e8] sm:$0xff]  }
  0x5c   :  { %1308 = vmatpush3.bf16.xpose.msra.mxu1 %v526_v50  ;;  %1289 = vmatprep.subr.bf16.mxu0 %v1499_v0  ;;  %v850_v50 = vsel %vm188_vm0, %v1455_v48, 0  ;;  %v957_v51 = vsel %vm188_vm0, %v1456_v49, 0 }
  0x5d   :  { %1309 = vmatprep.subr.bf16.mxu1 %v1499_v0 }
  0x63   :  { %1290 = vmatpush3.bf16.xpose.msra.mxu0 %v416_v53  ;;  %v1458_v53 = vld [vmem:[%s1887_s1 + $0x1e0] sm:$0xff]  }
  0x64   :  { %1310 = vmatpush3.bf16.xpose.msra.mxu1 %v523_v54  ;;  %1291 = vmatprep.subr.bf16.mxu0 %v1499_v0  ;;  %v847_v54 = vsel %vm188_vm0, %v1457_v52, 0  ;;  %v954_v55 = vsel %vm188_vm0, %v1458_v53, 0 }
  0x65   :  { %1311 = vmatprep.subr.bf16.mxu1 %v1499_v0 }
  0x6b   :  { %1292 = vmatpush3.bf16.xpose.msra.mxu0 %v413_v57  ;;  %v1460_v57 = vld [vmem:[%s1887_s1 + $0x1d8] sm:$0xff]  }
  0x6c   :  { %1312 = vmatpush3.bf16.xpose.msra.mxu1 %v520_v58  ;;  %1293 = vmatprep.subr.bf16.mxu0 %v1499_v0  ;;  %v844_v58 = vsel %vm188_vm0, %v1459_v56, 0  ;;  %v951_v59 = vsel %vm188_vm0, %v1460_v57, 0 }
  0x6d   :  { %1313 = vmatprep.subr.bf16.mxu1 %v1499_v0 }
  0x73   :  { %1294 = vmatpush3.bf16.xpose.msra.mxu0 %v410_v61  ;;  %v1462_v61 = vld [vmem:[%s1887_s1 + $0x1d0] sm:$0xff]  }
  0x74   :  { %1314 = vmatpush3.bf16.xpose.msra.mxu1 %v517_v62  ;;  %1295 = vmatprep.subr.bf16.mxu0 %v1499_v0  ;;  %v841_v62 = vsel %vm188_vm0, %v1461_v60, 0  ;;  %v948_v63 = vsel %vm188_vm0, %v1462_v61, 0 }
  0x75   :  { %1315 = vmatprep.subr.bf16.mxu1 %v1499_v0 }
  0x7b   :  { %1296 = vmatpush3.bf16.xpose.msra.mxu0 %v407_v2  ;;  %v1464_v2 = vld [vmem:[%s1887_s1 + $0x1c8] sm:$0xff]  }
  0x7c   :  { %1316 = vmatpush3.bf16.xpose.msra.mxu1 %v514_v3  ;;  %1321 = vmatprep.subr.bf16.mxu0 %v1499_v0  ;;  %v838_v3 = vsel %vm188_vm0, %v1463_v1, 0  ;;  %v945_v4 = vsel %vm188_vm0, %v1464_v2, 0 }
  0x7d   :  { %1341 = vmatprep.subr.bf16.mxu1 %v1499_v0 }
  0x82   :  { %1298 = vmatmul.mubr.msk.bf16.vlgmr.msra.gmra.mxu0 %vm188_vm0, %v14_v6  ;;  %v1466_v6 = vld [vmem:[%s1887_s1 + $0x1c0] sm:$0xff]  }
  0x83   :  { %1318 = vmatmul.mubr.msk.bf16.vlgmr.msra.gmra.mxu1 %vm188_vm0, %v15_v7  ;;  %1322 = vmatpush3.bf16.xpose.msra.mxu0 %v642_v8  ;;  %v835_v7 = vsel %vm188_vm0, %v1465_v5, 0  ;;  %v942_v8 = vsel %vm188_vm0, %v1466_v6, 0 }
  0x84   :  { %1342 = vmatpush3.bf16.xpose.msra.mxu1 %v749_v9  ;;  %1323 = vmatprep.subr.bf16.mxu0 %v1499_v0  ;;  %v18_v9 = vld [vmem:[%s1888_s0 + $0x18] sm:$0xf] }
  0x85   :  { %1343 = vmatprep.subr.bf16.mxu1 %v1499_v0  ;;  %1337 = vmatprep.mubr.msk.bf16.mxu0 %vm1500_vm1, %v1499_v0 }
  0x86   :  { %1357 = vmatprep.mubr.msk.bf16.mxu1 %vm1500_vm1, %v1499_v0 }
  0x8b   :  { %1324 = vmatpush3.bf16.xpose.msra.mxu0 %v639_v12 }
  0x8c   :  { %1344 = vmatpush3.bf16.xpose.msra.mxu1 %v746_v13  ;;  %1325 = vmatprep.subr.bf16.mxu0 %v1499_v0 }
  0x8d   :  { %1345 = vmatprep.subr.bf16.mxu1 %v1499_v0 }
  0x93   :  { %1326 = vmatpush3.bf16.xpose.msra.mxu0 %v636_v16 }
  0x94   :  { %1346 = vmatpush3.bf16.xpose.msra.mxu1 %v743_v17  ;;  %1327 = vmatprep.subr.bf16.mxu0 %v1499_v0 }
  0x95   :  { %1347 = vmatprep.subr.bf16.mxu1 %v1499_v0 }
  0x9b   :  { %1328 = vmatpush3.bf16.xpose.msra.mxu0 %v633_v20 }
  0x9c   :  { %1348 = vmatpush3.bf16.xpose.msra.mxu1 %v740_v21  ;;  %1329 = vmatprep.subr.bf16.mxu0 %v1499_v0 }
  0x9d   :  { %1349 = vmatprep.subr.bf16.mxu1 %v1499_v0 }
  0xa3   :  { %1330 = vmatpush3.bf16.xpose.msra.mxu0 %v630_v24 }
  0xa4   :  { %1350 = vmatpush3.bf16.xpose.msra.mxu1 %v737_v25  ;;  %1331 = vmatprep.subr.bf16.mxu0 %v1499_v0 }
  0xa5   :  { %1351 = vmatprep.subr.bf16.mxu1 %v1499_v0 }
  0xab   :  { %1332 = vmatpush3.bf16.xpose.msra.mxu0 %v627_v28 }
  0xac   :  { %1352 = vmatpush3.bf16.xpose.msra.mxu1 %v734_v29  ;;  %1333 = vmatprep.subr.bf16.mxu0 %v1499_v0 }
  0xad   :  { %1353 = vmatprep.subr.bf16.mxu1 %v1499_v0 }
  0xb3   :  { %1334 = vmatpush3.bf16.xpose.msra.mxu0 %v624_v32 }
  0xb4   :  { %1354 = vmatpush3.bf16.xpose.msra.mxu1 %v731_v33  ;;  %1335 = vmatprep.subr.bf16.mxu0 %v1499_v0 }
  0xb5   :  { %1355 = vmatprep.subr.bf16.mxu1 %v1499_v0 }
  0xbb   :  { %1336 = vmatpush3.bf16.xpose.msra.mxu0 %v621_v36 }
  0xbc   :  { %1356 = vmatpush3.bf16.xpose.msra.mxu1 %v728_v37  ;;  %1361 = vmatprep.subr.bf16.mxu0 %v1499_v0 }
  0xbd   :  { %1381 = vmatprep.subr.bf16.mxu1 %v1499_v0 }
  0xc2   :  { %1338 = vmatmul.mubr.msk.bf16.vlgmr.msra.gmra.mxu0 %vm188_vm0, %v16_v40 }
  0xc3   :  { %1358 = vmatmul.mubr.msk.bf16.vlgmr.msra.gmra.mxu1 %vm188_vm0, %v17_v41  ;;  %1362 = vmatpush3.bf16.xpose.msra.mxu0 %v856_v42 }
  0xc4   :  { %1382 = vmatpush3.bf16.xpose.msra.mxu1 %v963_v43  ;;  %1363 = vmatprep.subr.bf16.mxu0 %v1499_v0 }
  0xc5   :  { %1383 = vmatprep.subr.bf16.mxu1 %v1499_v0  ;;  %1377 = vmatprep.mubr.msk.bf16.mxu0 %vm1500_vm1, %v1499_v0 }
  0xc6   :  { %1397 = vmatprep.mubr.msk.bf16.mxu1 %vm1500_vm1, %v1499_v0 }
  0xcb   :  { %1364 = vmatpush3.bf16.xpose.msra.mxu0 %v853_v46 }
  0xcc   :  { %1384 = vmatpush3.bf16.xpose.msra.mxu1 %v960_v47  ;;  %1365 = vmatprep.subr.bf16.mxu0 %v1499_v0 }
  0xcd   :  { %1385 = vmatprep.subr.bf16.mxu1 %v1499_v0 }
  0xd3   :  { %1366 = vmatpush3.bf16.xpose.msra.mxu0 %v850_v50 }
  0xd4   :  { %1386 = vmatpush3.bf16.xpose.msra.mxu1 %v957_v51  ;;  %1367 = vmatprep.subr.bf16.mxu0 %v1499_v0 }
  0xd5   :  { %1387 = vmatprep.subr.bf16.mxu1 %v1499_v0 }
  0xdb   :  { %1368 = vmatpush3.bf16.xpose.msra.mxu0 %v847_v54 }
  0xdc   :  { %1388 = vmatpush3.bf16.xpose.msra.mxu1 %v954_v55  ;;  %1369 = vmatprep.subr.bf16.mxu0 %v1499_v0 }
  0xdd   :  { %1389 = vmatprep.subr.bf16.mxu1 %v1499_v0 }
  0xe3   :  { %1370 = vmatpush3.bf16.xpose.msra.mxu0 %v844_v58 }
  0xe4   :  { %1390 = vmatpush3.bf16.xpose.msra.mxu1 %v951_v59  ;;  %1371 = vmatprep.subr.bf16.mxu0 %v1499_v0 }
  0xe5   :  { %1391 = vmatprep.subr.bf16.mxu1 %v1499_v0 }
  0xeb   :  { %1372 = vmatpush3.bf16.xpose.msra.mxu0 %v841_v62 }
  0xec   :  { %1392 = vmatpush3.bf16.xpose.msra.mxu1 %v948_v63  ;;  %1373 = vmatprep.subr.bf16.mxu0 %v1499_v0 }
  0xed   :  { %1393 = vmatprep.subr.bf16.mxu1 %v1499_v0 }
  0xf3   :  { %1374 = vmatpush3.bf16.xpose.msra.mxu0 %v838_v3 }
  0xf4   :  { %1394 = vmatpush3.bf16.xpose.msra.mxu1 %v945_v4  ;;  %1375 = vmatprep.subr.bf16.mxu0 %v1499_v0 }
  0xf5   :  { %1395 = vmatprep.subr.bf16.mxu1 %v1499_v0 }
  0xfb   :  { %1376 = vmatpush3.bf16.xpose.msra.mxu0 %v835_v7 }
  0xfc   :  { %1396 = vmatpush3.bf16.xpose.msra.mxu1 %v942_v8 }
 0x102   :  { %v250_v11 = vpop.f32.mrf.mxu0  ;;  %1378 = vmatmul.mubr.msk.bf16.vlgmr.msra.gmra.mxu0 %vm188_vm0, %v18_v9 }
 0x103   :  { %v1021_v0 = vand.u32 2147483647, %v250_v11  ;;  %v357_v12 = vpop.f32.mrf.mxu1  ;;  %1398 = vmatmul.mubr.msk.bf16.vlgmr.msra.gmra.mxu1 %vm188_vm0, %v19_v10  ;;  %v1005_v28 = vsub.f32 0.0, %v250_v11 }
 0x104   :  { %v1022_v13 = vand.u32 2147483647, %v357_v12  ;;  %v1259_v14 = vpop.f32.mrf.mxu0  ;;  %v1006_v29 = vsub.f32 0.0, %v357_v12 }
 0x105   :  { %v1029_v15 = vsub.f32 0.0, %v1021_v0  ;;  %v1279_v16 = vpop.f32.mrf.mxu1  ;;  %v1013_v32 = vmax.f32 %v1005_v28, 0.0 }
 0x106   :  { %v1030_v17 = vsub.f32 0.0, %v1022_v13  ;;  %v253_v18 = vpop.f32.mrf.mxu0  ;;  %v1014_v34 = vmax.f32 %v1006_v29, 0.0 }
 0x107   :  { %v1037_v19 = vmul.f32 1.442695, %v1029_v15  ;;  %v360_v20 = vpop.f32.mrf.mxu1 }
 0x108   :  { %v1039_v21 = vmul.f32 1.442695, %v1030_v17  ;;  %v1260_v22 = vpop.f32.mrf.mxu0 }
 0x109   :  { %1467 = vpow2.f32 %v1037_v19  ;;  %v1280_v23 = vpop.f32.mrf.mxu1 }
 0x10a   :  { %1469 = vpow2.f32 %v1039_v21 }
 0x116   :  { %v1468_v24 = vpop.eup %1467 }
 0x117   :  { %v1470_v25 = vpop.eup %1469  ;;  %v1053_v26 = vadd.f32 1.0, %v1468_v24 }
 0x118   :  { %v1054_v27 = vadd.f32 1.0, %v1470_v25 }
 0x119   :  { %1471 = vlog2.f32 %v1053_v26 }
 0x11a   :  { %1473 = vlog2.f32 %v1054_v27 }
 0x126   :  { %v1472_v30 = vpop.eup %1471 }
 0x127   :  { %v1474_v31 = vpop.eup %1473  ;;  %v1062_v33 = vmul.f32 0.6931472, %v1472_v30 }
 0x128   :  { %v1064_v35 = vmul.f32 0.6931472, %v1474_v31 }
 0x129   :  { %v1077_v36 = vadd.f32 %v1062_v33, %v1013_v32 }
 0x12a   :  { %v1078_v37 = vadd.f32 %v1064_v35, %v1014_v34 }
 0x12c   :  { %v1085_v38 = vadd.f32 %v1078_v37, %v1077_v36 }
 0x142   :  { %v464_v39 = vpop.f32.mrf.mxu0 }
 0x143   :  { %v1023_v40 = vand.u32 2147483647, %v464_v39  ;;  %v571_v41 = vpop.f32.mrf.mxu1  ;;  %v1007_v57 = vsub.f32 0.0, %v464_v39 }
 0x144   :  { %v1024_v42 = vand.u32 2147483647, %v571_v41  ;;  %v1299_v43 = vpop.f32.mrf.mxu0  ;;  %v1008_v58 = vsub.f32 0.0, %v571_v41 }
 0x145   :  { %v1031_v44 = vsub.f32 0.0, %v1023_v40  ;;  %v1319_v45 = vpop.f32.mrf.mxu1  ;;  %v1015_v61 = vmax.f32 %v1007_v57, 0.0 }
 0x146   :  { %v1032_v46 = vsub.f32 0.0, %v1024_v42  ;;  %v467_v47 = vpop.f32.mrf.mxu0  ;;  %v1016_v2 = vmax.f32 %v1008_v58, 0.0 }
 0x147   :  { %v1041_v48 = vmul.f32 1.442695, %v1031_v44  ;;  %v574_v49 = vpop.f32.mrf.mxu1 }
 0x148   :  { %v1043_v50 = vmul.f32 1.442695, %v1032_v46  ;;  %v1300_v51 = vpop.f32.mrf.mxu0 }
 0x149   :  { %1475 = vpow2.f32 %v1041_v48  ;;  %v1320_v52 = vpop.f32.mrf.mxu1 }
 0x14a   :  { %1477 = vpow2.f32 %v1043_v50 }
 0x156   :  { %v1476_v53 = vpop.eup %1475 }
 0x157   :  { %v1478_v54 = vpop.eup %1477  ;;  %v1055_v55 = vadd.f32 1.0, %v1476_v53 }
 0x158   :  { %v1056_v56 = vadd.f32 1.0, %v1478_v54 }
 0x159   :  { %1479 = vlog2.f32 %v1055_v55 }
 0x15a   :  { %1481 = vlog2.f32 %v1056_v56 }
 0x166   :  { %v1480_v59 = vpop.eup %1479 }
 0x167   :  { %v1482_v60 = vpop.eup %1481  ;;  %v1066_v62 = vmul.f32 0.6931472, %v1480_v59 }
 0x168   :  { %v1068_v63 = vmul.f32 0.6931472, %v1482_v60 }
 0x169   :  { %v1079_v1 = vadd.f32 %v1066_v62, %v1015_v61 }
 0x16a   :  { %v1080_v4 = vadd.f32 %v1068_v63, %v1016_v2 }
 0x16b   :  { %v1086_v3 = vadd.f32 %v1085_v38, %v1079_v1 }
 0x16d   :  { %v1087_v5 = vadd.f32 %v1086_v3, %v1080_v4 }
 0x182   :  { %v678_v6 = vpop.f32.mrf.mxu0 }
 0x183   :  { %v1025_v7 = vand.u32 2147483647, %v678_v6  ;;  %v785_v8 = vpop.f32.mrf.mxu1  ;;  %v1009_v23 = vsub.f32 0.0, %v678_v6 }
 0x184   :  { %v1026_v9 = vand.u32 2147483647, %v785_v8  ;;  %v1339_v10 = vpop.f32.mrf.mxu0  ;;  %v1010_v24 = vsub.f32 0.0, %v785_v8 }
 0x185   :  { %v1033_v11 = vsub.f32 0.0, %v1025_v7  ;;  %v1359_v0 = vpop.f32.mrf.mxu1  ;;  %v1017_v27 = vmax.f32 %v1009_v23, 0.0 }
 0x186   :  { %v1034_v12 = vsub.f32 0.0, %v1026_v9  ;;  %v681_v13 = vpop.f32.mrf.mxu0  ;;  %v1018_v31 = vmax.f32 %v1010_v24, 0.0 }
 0x187   :  { %v1045_v14 = vmul.f32 1.442695, %v1033_v11  ;;  %v788_v15 = vpop.f32.mrf.mxu1 }
 0x188   :  { %v1047_v16 = vmul.f32 1.442695, %v1034_v12  ;;  %v1340_v17 = vpop.f32.mrf.mxu0 }
 0x189   :  { %1483 = vpow2.f32 %v1045_v14  ;;  %v1360_v18 = vpop.f32.mrf.mxu1 }
 0x18a   :  { %1485 = vpow2.f32 %v1047_v16 }
 0x196   :  { %v1484_v19 = vpop.eup %1483 }
 0x197   :  { %v1486_v20 = vpop.eup %1485  ;;  %v1057_v21 = vadd.f32 1.0, %v1484_v19 }
 0x198   :  { %v1058_v22 = vadd.f32 1.0, %v1486_v20 }
 0x199   :  { %1487 = vlog2.f32 %v1057_v21 }
 0x19a   :  { %1489 = vlog2.f32 %v1058_v22 }
 0x1a6   :  { %v1488_v25 = vpop.eup %1487 }
 0x1a7   :  { %v1490_v26 = vpop.eup %1489  ;;  %v1070_v28 = vmul.f32 0.6931472, %v1488_v25 }
 0x1a8   :  { %v1072_v29 = vmul.f32 0.6931472, %v1490_v26 }
 0x1a9   :  { %v1081_v30 = vadd.f32 %v1070_v28, %v1017_v27 }
 0x1aa   :  { %v1082_v33 = vadd.f32 %v1072_v29, %v1018_v31 }
 0x1ab   :  { %v1088_v32 = vadd.f32 %v1087_v5, %v1081_v30 }
 0x1ad   :  { %v1089_v34 = vadd.f32 %v1088_v32, %v1082_v33 }
 0x1c2   :  { %v892_v35 = vpop.f32.mrf.mxu0 }
 0x1c3   :  { %v1027_v36 = vand.u32 2147483647, %v892_v35  ;;  %v999_v37 = vpop.f32.mrf.mxu1  ;;  %v1011_v53 = vsub.f32 0.0, %v892_v35 }
 0x1c4   :  { %v1028_v38 = vand.u32 2147483647, %v999_v37  ;;  %v1379_v39 = vpop.f32.mrf.mxu0  ;;  %v1012_v54 = vsub.f32 0.0, %v999_v37 }
 0x1c5   :  { %v1035_v40 = vsub.f32 0.0, %v1027_v36  ;;  %v1399_v41 = vpop.f32.mrf.mxu1  ;;  %v1019_v57 = vmax.f32 %v1011_v53, 0.0 }
 0x1c6   :  { %v1036_v42 = vsub.f32 0.0, %v1028_v38  ;;  %v895_v43 = vpop.f32.mrf.mxu0  ;;  %v1020_v61 = vmax.f32 %v1012_v54, 0.0 }
 0x1c7   :  { %v1049_v44 = vmul.f32 1.442695, %v1035_v40  ;;  %v1002_v45 = vpop.f32.mrf.mxu1 }
 0x1c8   :  { %v1051_v46 = vmul.f32 1.442695, %v1036_v42  ;;  %v1380_v47 = vpop.f32.mrf.mxu0 }
 0x1c9   :  { %1491 = vpow2.f32 %v1049_v44  ;;  %v1400_v48 = vpop.f32.mrf.mxu1 }
 0x1ca   :  { %1493 = vpow2.f32 %v1051_v46 }
 0x1d6   :  { %v1492_v49 = vpop.eup %1491 }
 0x1d7   :  { %v1494_v50 = vpop.eup %1493  ;;  %v1059_v51 = vadd.f32 1.0, %v1492_v49 }
 0x1d8   :  { %v1060_v52 = vadd.f32 1.0, %v1494_v50 }
 0x1d9   :  { %1495 = vlog2.f32 %v1059_v51 }
 0x1da   :  { %1497 = vlog2.f32 %v1060_v52 }
 0x1e6   :  { %v1496_v55 = vpop.eup %1495 }
 0x1e7   :  { %v1498_v56 = vpop.eup %1497  ;;  %v1074_v58 = vmul.f32 0.6931472, %v1496_v55 }
 0x1e8   :  { %v1076_v59 = vmul.f32 0.6931472, %v1498_v56 }
 0x1e9   :  { %v1083_v60 = vadd.f32 %v1074_v58, %v1019_v57 }
 0x1ea   :  { %v1084_v63 = vadd.f32 %v1076_v59, %v1020_v61 }
 0x1eb   :  { %v1090_v62 = vadd.f32 %v1089_v34, %v1083_v60 }
 0x1ed   :  { %v1091_v1 = vadd.f32 %v1090_v62, %v1084_v63 }
 0x1ef   :  { %1092 = vst [vmem:[%s1889_s2] sm:$0xff] %v1091_v1 }

</bundles_post_ra>
